<compile_context>
chip_gen: v7x
topology: tpu7x:2x2x1
jax: 0.10.0
libtpu: 0.0.40
codegen_flags: <defaults>
</compile_context>

<pallas_src>
import jax
import jax.numpy as jnp
from jax.experimental import pallas as pl
from jax.experimental.pallas import tpu as pltpu


def _round_up(x, m):
    return (x + m - 1) // m * m


def center_loss_kernel(feat_ref, label_ref, inv_ref, pc_ref, e_ref, cls_ref,
                       seg_ref, out_ref):
    """One grid step: TB4 packed rows (= TB4*pack samples) -> one partial sum."""
    feat = feat_ref[...].astype(jnp.float32)      # [TB4, pack*D]
    lbl = label_ref[...].astype(jnp.float32)      # [TB4, pack]  small ints, exact
    inv = inv_ref[...]                            # [TB4, pack]  f32 (0 for pad rows)

    # Broadcast each packed slot's label across its C one-hot columns with an
    # exact 0/1 matmul (no cross-lane gather needed):
    #   lbl_cols[i, j*C + c] = label[i, j]
    lbl_cols = jnp.dot(lbl, e_ref[...], preferred_element_type=jnp.float32)
    onehot = (lbl_cols == cls_ref[...]).astype(jnp.float32)          # [TB4, pack*C]

    # Packed gather of class centers via the block-diagonal packed-centers
    # matrix: centers_exp[i, j*D:(j+1)*D] = centers[label[i, j], :].  Exact.
    centers_exp = jnp.dot(onehot, pc_ref[...],
                          preferred_element_type=jnp.float32)        # [TB4, pack*D]

    diff = feat - centers_exp
    # Per-sample (lane-segmented over D) sum of squares via 0/1 MXU matmul.
    sq = jnp.dot(diff * diff, seg_ref[...],
                 preferred_element_type=jnp.float32)                 # [TB4, pack]
    w = jnp.sqrt(sq) * inv                                           # [TB4, pack]

    # Per-block partial sum, written as a lane-dense (8,128) tile; the wrapper
    # reduces across blocks.  With one output block per grid step the batch
    # axis can be "parallel" (uses both TCs on v7x, no accumulator race).
    partial = jnp.sum(w)
    out_ref[...] = jnp.full(out_ref.shape, partial, dtype=jnp.float32)


def center_loss(feat, centers, label, *, block_rows=8192):
    """feat: [B, D], centers: [C, D], label: [B] int -> scalar f32 loss."""
    b, d = feat.shape
    c = centers.shape[0]
    centers_f32 = centers.astype(jnp.float32)
    label = label.astype(jnp.int32)

    # torch.histc(label, bins=C, min=0, max=C) for integer labels in [0, C) is
    # the per-class count; compute exactly in the wrapper (tiny scatter-add).
    count = jnp.zeros((c,), jnp.float32).at[label].add(1.0)          # [C]
    inv_num = (1.0 / count[label]).astype(jnp.float32)               # [B]

    # Lane packing: pack samples so one packed row fills the 128-lane vreg.
    pack = 128 // d if (d <= 128 and 128 % d == 0) else 1
    lanes = pack * d
    row_align = 8 * pack                       # packed sublane dim multiple of 8

    tb_rows = min(_round_up(b, row_align), _round_up(block_rows, row_align))
    bp = _round_up(b, tb_rows)
    pad = bp - b
    if pad:
        feat = jnp.pad(feat, ((0, pad), (0, 0)))
        label = jnp.pad(label, (0, pad))       # pad label 0 (any valid class)
        inv_num = jnp.pad(inv_num, (0, pad))   # pad weight 0 -> no contribution

    bp4 = bp // pack
    tb4 = tb_rows // pack
    num_blocks = bp4 // tb4

    # Free, contiguous packing reshapes (feat keeps its upstream dtype).
    feat_p = feat.reshape(bp4, lanes)
    label_p = label.reshape(bp4, pack)
    inv_p = inv_num.reshape(bp4, pack)

    # Loop-invariant 0/1 scaffolding, built once and kept resident in VMEM.
    # Block-diagonal packed centers: row j*C + c holds centers[c] in lanes
    # [j*D, (j+1)*D).
    pc = jnp.kron(jnp.eye(pack, dtype=jnp.float32), centers_f32)     # [pack*C, lanes]
    # E[j, k] = 1 iff column k belongs to packed slot j (k // C == j).
    e_mat = (jnp.arange(pack)[:, None] ==
             (jnp.arange(pack * c)[None, :] // c)).astype(jnp.float32)  # [pack, pack*C]
    # Class id of each one-hot column.
    cls_row = (jnp.arange(pack * c) % c).astype(jnp.float32).reshape(1, pack * c)
    # Segment-sum matrix: lane l belongs to packed sample l // D.
    seg = (jnp.arange(lanes)[:, None] // d ==
           jnp.arange(pack)[None, :]).astype(jnp.float32)            # [lanes, pack]

    cost = pl.CostEstimate(
        flops=int(2 * bp4 * (pack * c) * lanes          # one-hot @ packed centers
                  + 2 * bp4 * lanes * pack              # segmented sum-of-squares
                  + 2 * bp4 * pack * (pack * c)         # label broadcast matmul
                  + 4 * bp4 * lanes),                   # elementwise
        transcendentals=int(bp),                        # one sqrt per sample
        bytes_accessed=int(feat_p.size * feat_p.dtype.itemsize
                           + label_p.size * 4 + inv_p.size * 4
                           + pc.size * 4 + num_blocks * 8 * 128 * 4),
    )

    out = pl.pallas_call(
        center_loss_kernel,
        out_shape=jax.ShapeDtypeStruct((num_blocks, 8, 128), jnp.float32),
        grid=(num_blocks,),
        in_specs=[
            pl.BlockSpec((tb4, lanes), lambda i: (i, 0)),        # feat (packed, streamed)
            pl.BlockSpec((tb4, pack), lambda i: (i, 0)),         # labels (packed, streamed)
            pl.BlockSpec((tb4, pack), lambda i: (i, 0)),         # 1/num (packed, streamed)
            pl.BlockSpec((pack * c, lanes), lambda i: (0, 0)),   # packed centers (resident)
            pl.BlockSpec((pack, pack * c), lambda i: (0, 0)),    # E (resident)
            pl.BlockSpec((1, pack * c), lambda i: (0, 0)),       # class ids (resident)
            pl.BlockSpec((lanes, pack), lambda i: (0, 0)),       # segment-sum (resident)
        ],
        out_specs=pl.BlockSpec((1, 8, 128), lambda i: (i, 0, 0)),
        compiler_params=pltpu.CompilerParams(
            # Per-block partial outputs -> batch axis is safely parallel
            # (both TensorCores on v7x; no-op on 1-TC v5e/v6e).
            dimension_semantics=("parallel",),
            # Raise v5e's 16 MiB scoped-VMEM default; equals v6e/v7x default
            # and well within v7x's 64 MiB physical VMEM.
            vmem_limit_bytes=32 * 1024 * 1024,
        ),
        cost_estimate=cost,
    )(feat_p, label_p, inv_p, pc, e_mat, cls_row, seg)

    # Lane-dense per-block partials -> final reduce + /B in the wrapper.
    return jnp.sum(out[:, 0, 0]) / jnp.float32(b)


def center_loss_ref(feat, centers, label):
    """Pure-JAX reference mirroring the PyTorch forward."""
    centers_exp = centers[label]                                     # [B, D]
    count = jnp.zeros((centers.shape[0],), jnp.float32).at[label].add(1.0)
    num = count[label]                                               # [B]
    dist = jnp.sqrt(jnp.sum((feat - centers_exp) ** 2, axis=1))
    return jnp.sum(dist / num) / feat.shape[0]


if __name__ == "__main__":
    num_classes = 10
    feature_dim = 32

    key = jax.random.PRNGKey(0)
    k_feat, k_centers, k_label = jax.random.split(key, 3)

    # Deterministic "randn" init for the nn.Parameter centers.
    centers = jax.random.normal(k_centers, (num_classes, feature_dim),
                                dtype=jnp.float32)

    ok = True
    for batch in (8, 100):   # second case exercises padding / packing tails
        kf, kl = jax.random.split(jax.random.fold_in(k_feat, batch))
        feat = jax.random.normal(kf, (batch, feature_dim), dtype=jnp.float32)
        label = jax.random.randint(kl, (batch,), 0, num_classes, dtype=jnp.int32)

        loss = jax.block_until_ready(center_loss(feat, centers, label))
        ref = jax.block_until_ready(center_loss_ref(feat, centers, label))
        if not jnp.allclose(loss, ref, rtol=1e-5, atol=1e-5):
            ok = False
            print("MISMATCH", batch, loss, ref)

    if ok:
        print("KERNEL_OK")
</pallas_src>

<mosaic_0001>
module attributes {stable_mosaic.version = 11 : i64} {
  func.func @center_loss_kernel(%arg0: i32, %arg1: memref<8x128xf32, #tpu.memory_space<vmem>>, %arg2: memref<8x4xi32, #tpu.memory_space<vmem>>, %arg3: memref<8x4xf32, #tpu.memory_space<vmem>>, %arg4: memref<40x128xf32, #tpu.memory_space<vmem>>, %arg5: memref<4x40xf32, #tpu.memory_space<vmem>>, %arg6: memref<1x40xf32, #tpu.memory_space<vmem>>, %arg7: memref<128x4xf32, #tpu.memory_space<vmem>>, %arg8: memref<1x8x128xf32, #tpu.memory_space<vmem>>) attributes {dimension_semantics = [#tpu.dimension_semantics<parallel>], iteration_bounds = array<i64: 1>, scalar_prefetch = 0 : i64, scratch_operands = 0 : i64, tpu.core_type = #tpu.core_type<tc>, window_params = [{transform_indices = @transform_0, window_bounds = array<i64: 8, 128>}, {transform_indices = @transform_1, window_bounds = array<i64: 8, 4>}, {transform_indices = @transform_2, window_bounds = array<i64: 8, 4>}, {pipeline_mode = #tpu.pipeline_mode<synchronous>, transform_indices = @transform_3, window_bounds = array<i64: 40, 128>}, {pipeline_mode = #tpu.pipeline_mode<synchronous>, transform_indices = @transform_4, window_bounds = array<i64: 4, 40>}, {pipeline_mode = #tpu.pipeline_mode<synchronous>, transform_indices = @transform_5, window_bounds = array<i64: 1, 40>}, {pipeline_mode = #tpu.pipeline_mode<synchronous>, transform_indices = @transform_6, window_bounds = array<i64: 128, 4>}, {transform_indices = @transform_7, window_bounds = array<i64: 1, 8, 128>}]} {
    %c0 = arith.constant 0 : index
    %c0_0 = arith.constant 0 : index
    %0 = vector.load %arg1[%c0, %c0_0] : memref<8x128xf32, #tpu.memory_space<vmem>>, vector<8x128xf32>
    %c0_1 = arith.constant 0 : index
    %c0_2 = arith.constant 0 : index
    %1 = vector.load %arg2[%c0_1, %c0_2] : memref<8x4xi32, #tpu.memory_space<vmem>>, vector<8x4xi32>
    %2 = arith.sitofp %1 : vector<8x4xi32> to vector<8x4xf32>
    %c0_3 = arith.constant 0 : index
    %c0_4 = arith.constant 0 : index
    %3 = vector.load %arg3[%c0_3, %c0_4] : memref<8x4xf32, #tpu.memory_space<vmem>>, vector<8x4xf32>
    %c0_5 = arith.constant 0 : index
    %c0_6 = arith.constant 0 : index
    %4 = vector.load %arg5[%c0_5, %c0_6] : memref<4x40xf32, #tpu.memory_space<vmem>>, vector<4x40xf32>
    %cst = arith.constant dense<0.000000e+00> : vector<8x40xf32>
    %5 = tpu.matmul %2, %4, %cst {dimension_numbers = #tpu.dot_dimension_numbers<[1], [0], [0], [1], [0, 0, 1, 1], [], []>} : vector<8x4xf32>, vector<4x40xf32>, vector<8x40xf32> -> vector<8x40xf32>
    %c0_7 = arith.constant 0 : index
    %c0_8 = arith.constant 0 : index
    %6 = vector.load %arg6[%c0_7, %c0_8] : memref<1x40xf32, #tpu.memory_space<vmem>>, vector<1x40xf32>
    %7 = vector.broadcast %6 : vector<1x40xf32> to vector<8x40xf32>
    %8 = arith.cmpf oeq, %5, %7 : vector<8x40xf32>
    %9 = arith.extui %8 : vector<8x40xi1> to vector<8x40xi32>
    %10 = arith.sitofp %9 : vector<8x40xi32> to vector<8x40xf32>
    %c0_9 = arith.constant 0 : index
    %c0_10 = arith.constant 0 : index
    %11 = vector.load %arg4[%c0_9, %c0_10] : memref<40x128xf32, #tpu.memory_space<vmem>>, vector<40x128xf32>
    %cst_11 = arith.constant dense<0.000000e+00> : vector<8x128xf32>
    %12 = tpu.matmul %10, %11, %cst_11 {dimension_numbers = #tpu.dot_dimension_numbers<[1], [0], [0], [1], [0, 0, 1, 1], [], []>} : vector<8x40xf32>, vector<40x128xf32>, vector<8x128xf32> -> vector<8x128xf32>
    %13 = arith.subf %0, %12 : vector<8x128xf32>
    %14 = arith.mulf %13, %13 : vector<8x128xf32>
    %c0_12 = arith.constant 0 : index
    %c0_13 = arith.constant 0 : index
    %15 = vector.load %arg7[%c0_12, %c0_13] : memref<128x4xf32, #tpu.memory_space<vmem>>, vector<128x4xf32>
    %cst_14 = arith.constant dense<0.000000e+00> : vector<8x4xf32>
    %16 = tpu.matmul %14, %15, %cst_14 {dimension_numbers = #tpu.dot_dimension_numbers<[1], [0], [0], [1], [0, 0, 1, 1], [], []>} : vector<8x128xf32>, vector<128x4xf32>, vector<8x4xf32> -> vector<8x4xf32>
    %17 = math.sqrt %16 : vector<8x4xf32>
    %18 = arith.mulf %17, %3 : vector<8x4xf32>
    %19 = vector.shape_cast %18 : vector<8x4xf32> to vector<1x8x4xf32>
    %cst_15 = arith.constant dense<0.000000e+00> : vector<1xf32>
    %20 = vector.multi_reduction <add>, %19, %cst_15 [1, 2] : vector<1x8x4xf32> to vector<1xf32>
    %21 = vector.shape_cast %20 : vector<1xf32> to vector<1x1x1xf32>
    %22 = vector.extract %21[0, 0, 0] : f32 from vector<1x1x1xf32>
    %23 = vector.broadcast %22 : f32 to vector<1x8x128xf32>
    %c0_16 = arith.constant 0 : index
    %c0_17 = arith.constant 0 : index
    %c0_18 = arith.constant 0 : index
    %24 = vector.load %arg8[%c0_16, %c0_17, %c0_18] : memref<1x8x128xf32, #tpu.memory_space<vmem>>, vector<1x8x128xf32>
    tpu.vector_store %arg8[%c0_16, %c0_17, %c0_18], %23 {strides = array<i32>} : memref<1x8x128xf32, #tpu.memory_space<vmem>>, vector<1x8x128xf32>,
    return
  }
  func.func @transform_0(%arg0: i32) -> (i32, i32) {
    %c0_i32 = arith.constant 0 : i32
    %c0_i32_0 = arith.constant 0 : i32
    return %arg0, %c0_i32 : i32, i32
  }
  func.func @transform_1(%arg0: i32) -> (i32, i32) {
    %c0_i32 = arith.constant 0 : i32
    %c0_i32_0 = arith.constant 0 : i32
    return %arg0, %c0_i32 : i32, i32
  }
  func.func @transform_2(%arg0: i32) -> (i32, i32) {
    %c0_i32 = arith.constant 0 : i32
    %c0_i32_0 = arith.constant 0 : i32
    return %arg0, %c0_i32 : i32, i32
  }
  func.func @transform_3(%arg0: i32) -> (i32, i32) {
    %c0_i32 = arith.constant 0 : i32
    %c0_i32_0 = arith.constant 0 : i32
    %c0_i32_1 = arith.constant 0 : i32
    return %c0_i32, %c0_i32_0 : i32, i32
  }
  func.func @transform_4(%arg0: i32) -> (i32, i32) {
    %c0_i32 = arith.constant 0 : i32
    %c0_i32_0 = arith.constant 0 : i32
    %c0_i32_1 = arith.constant 0 : i32
    return %c0_i32, %c0_i32_0 : i32, i32
  }
  func.func @transform_5(%arg0: i32) -> (i32, i32) {
    %c0_i32 = arith.constant 0 : i32
    %c0_i32_0 = arith.constant 0 : i32
    %c0_i32_1 = arith.constant 0 : i32
    return %c0_i32, %c0_i32_0 : i32, i32
  }
  func.func @transform_6(%arg0: i32) -> (i32, i32) {
    %c0_i32 = arith.constant 0 : i32
    %c0_i32_0 = arith.constant 0 : i32
    %c0_i32_1 = arith.constant 0 : i32
    return %c0_i32, %c0_i32_0 : i32, i32
  }
  func.func @transform_7(%arg0: i32) -> (i32, i32, i32) {
    %c0_i32 = arith.constant 0 : i32
    %c0_i32_0 = arith.constant 0 : i32
    %c0_i32_1 = arith.constant 0 : i32
    return %arg0, %c0_i32, %c0_i32_0 : i32, i32, i32
  }
}

</mosaic_0001>

<bundles_post_ra>
// kernel: tpu_custom_call.1
= control target key start
LH: loop header
LB: loop body
LE: loop exit
PB: predicated region body
PF: predicated region fallthrough
CT: control target
= control target key end

     0   :  { %vm36_vm0 = vcmask 1043456   ;;  %v466_v2 = vmov 0.0   ;;  %vm467_vm1 = vmmov 0   ;;  %vm32_vm2 = vcmask 31744   ;;  %s611_s0 = inlined_call_operand.vmem [shape: f32[8,128], index: 0, kind: input, shape index: {}]   ;;  %s612_s1 = inlined_call_operand.vmem [shape: s32[8,4], index: 1, kind: input, shape index: {}]   ;;  %s613_s2 = inlined_call_operand.vmem [shape: f32[8,4], index: 2, kind: input, shape index: {}]   ;;  %s614_s3 = inlined_call_operand.vmem [shape: f32[40,128], index: 3, kind: input, shape index: {}]   ;;  %s615_s4 = inlined_call_operand.vmem [shape: f32[4,40], index: 4, kind: input, shape index: {}]   ;;  %s616_s5 = inlined_call_operand.vmem [shape: f32[1,40], index: 5, kind: input, shape index: {}]   ;;  %s617_s6 = inlined_call_operand.vmem [shape: f32[128,4], index: 6, kind: input, shape index: {}]   ;;  %s618_s7 = inlined_call_operand.hbm [shape: f32[1,8,128], index: 7, kind: output, shape index: {}]  }
   0x1   :  { %v31_v0 = vld [vmem:[%s615_s4] sm:$0xf]  ;;  %351 = vmatprep.subr.mxu1 %v466_v2  ;;  %353 = vmatprep.mubr.msk.f32.mxu1 %vm467_vm1, %v466_v2  ;;  %v121_v5 = vld [vmem:[%s614_s3 + $0x8] sm:$0xff]  ;;  %v122_v6 = vld [vmem:[%s614_s3 + $0x10] sm:$0xff]  ;;  %v468_v9 = vmov 0.0|0.0  }
   0x2   :  { %v28_v1 = vld [vmem:[%s612_s1] sm:$0xff]  ;;  %352 = vmatpush3.msk.msra.mxu1 %vm36_vm0, %v31_v0  ;;  %v123_v8 = vld [vmem:[%s614_s3 + $0x18] sm:$0xff]  ;;  %410 = vmatprep.subr.bf16.mxu0 %v468_v9 }
   0x3   :  { %v29_v3 = vcvt.s32.f32 %v28_v1  ;;  %v120_v4 = vld [vmem:[%s614_s3] sm:$0xff] }
   0x4   :  { %v405_v7 = vpack.c.bf16 %v121_v5, %v120_v4 }
   0x5   :  { %12 = vsyncpa [#allocation3], 0  ;;  %354 = vmatmul.mubr.msk.f32.vlgmr.msra.gmra.mrb[0].mxu1 %vm32_vm2, %v29_v3  ;;  %404 = vmatprep.subr.bf16.mxu1 %v468_v9  ;;  %v408_v10 = vpack.c.bf16 %v123_v8, %v122_v6  ;;  %v124_v11 = vld [vmem:[%s614_s3 + $0x20] sm:$0xff]  ;;  %v202_v13 = vld [vmem:[%s617_s6 + $0x8] sm:$0xff]  ;;  %vm125_vm3 = vcmask 326656  }
   0x6   :  { %406 = vmatpush3.bf16.msra.mxu1 %v405_v7  ;;  %366 = vmatprep.mubr.msk.f32.mxu1 %vm467_vm1, %v466_v2  ;;  %v201_v12 = vld [vmem:[%s617_s6] sm:$0xff]  ;;  %v203_v14 = vld [vmem:[%s617_s6 + $0x10] sm:$0xff]  ;;  %v204_v16 = vld [vmem:[%s617_s6 + $0x18] sm:$0xff] }
   0x7   :  { %407 = vmatprep.subr.bf16.mxu1 %v468_v9  ;;  %401 = vmatprep.mubr.msk.f32.mxu0 %vm467_vm1, %v466_v2  ;;  %v411_v15 = vpack.c.bf16 %v202_v13, %v201_v12  ;;  %v414_v17 = vpack.c.bf16 %v204_v16, %v203_v14  ;;  %v205_v18 = vld [vmem:[%s617_s6 + $0x20] sm:$0xff]  ;;  %v206_v19 = vld [vmem:[%s617_s6 + $0x28] sm:$0xff]  ;;  %v207_v21 = vld [vmem:[%s617_s6 + $0x30] sm:$0xff] }
   0x8   :  { %v417_v20 = vpack.c.bf16 %v206_v19, %v205_v18  ;;  %v208_v22 = vld [vmem:[%s617_s6 + $0x38] sm:$0xff]  ;;  %v209_v24 = vld [vmem:[%s617_s6 + $0x40] sm:$0xff]  ;;  %v210_v25 = vld [vmem:[%s617_s6 + $0x48] sm:$0xff] }
   0x9   :  { %412 = vmatpush3.bf16.msra.mxu0 %v411_v15  ;;  %v420_v23 = vpack.c.bf16 %v208_v22, %v207_v21  ;;  %v423_v26 = vpack.c.bf16 %v210_v25, %v209_v24  ;;  %v211_v27 = vld [vmem:[%s617_s6 + $0x50] sm:$0xff]  ;;  %v212_v28 = vld [vmem:[%s617_s6 + $0x58] sm:$0xff]  ;;  %v213_v30 = vld [vmem:[%s617_s6 + $0x60] sm:$0xff] }
   0xa   :  { %409 = vmatpush3.bf16.msra.mxu1 %v408_v10  ;;  %413 = vmatprep.subr.bf16.mxu0 %v468_v9  ;;  %v426_v29 = vpack.c.bf16 %v212_v28, %v211_v27  ;;  %v214_v31 = vld [vmem:[%s617_s6 + $0x68] sm:$0xff]  ;;  %v323_v33 = vld [vmem:[%s616_s5] ss:$0 sm:$0xff]  ;;  %v215_v37 = vld [vmem:[%s617_s6 + $0x70] sm:$0xff] }
   0xb   :  { %364 = vmatprep.subr.mxu1 %v466_v2  ;;  %v429_v32 = vpack.c.bf16 %v214_v31, %v213_v30  ;;  %v216_v38 = vld [vmem:[%s617_s6 + $0x78] sm:$0xff]  ;;  %v27_v40 = vld [vmem:[%s611_s0] sm:$0xff]  ;;  %s469_s0 = smov [#allocation2]  }
   0xc   :  { %v432_v39 = vpack.c.bf16 %v216_v38, %v215_v37  ;;  %v30_v49 = vld [vmem:[%s613_s2] sm:$0xff]  ;;  %s313_s6 = sshll.u32 %s469_s0, 4  ;;  %s314_s6 = int_to_ptr.vmem [resolvable:$true] %s313_s6 }
   0xd   :  { %415 = vmatpush3.bf16.msra.mxu0 %v414_v17  ;;  %s442_s23 = scalar_lea.vmem %s314_s6, 128  ;;  %p447_p1 = scmp.lt.s32.totalorder %s314_s6, %s314_s6 }
   0xe   :  { %365 = vmatpush3.msra.mxu1 %v124_v11  ;;  %416 = vmatprep.subr.bf16.mxu0 %v468_v9  ;;  %p443_p0 = scmp.ne.s32.totalorder %s314_s6, %s442_s23  ;;  %p448_p2 = scmp.lt.s32.totalorder %s442_s23, %s442_s23 }
  0x10   :  { %p449_p3 = por %p448_p2, %p447_p1 }
  0x11   :  { %418 = vmatpush3.bf16.msra.mxu0 %v417_v20 }
  0x12   :  { %419 = vmatprep.subr.bf16.mxu0 %v468_v9  ;;  %p450_p4 = pnand %p449_p3, %p443_p0 }
  0x15   :  { %421 = vmatpush3.bf16.msra.mxu0 %v420_v23 }
  0x16   :  { %422 = vmatprep.subr.bf16.mxu0 %v468_v9 }
  0x19   :  { %424 = vmatpush3.bf16.msra.mxu0 %v423_v26 }
  0x1a   :  { %425 = vmatprep.subr.bf16.mxu0 %v468_v9 }
  0x1d   :  { %427 = vmatpush3.bf16.msra.mxu0 %v426_v29 }
  0x1e   :  { %428 = vmatprep.subr.bf16.mxu0 %v468_v9 }
  0x21   :  { %430 = vmatpush3.bf16.msra.mxu0 %v429_v32 }
  0x22   :  { %431 = vmatprep.subr.bf16.mxu0 %v468_v9 }
  0x25   :  { %433 = vmatpush3.bf16.msra.mxu0 %v432_v39 }
  0xd8   :  { %v106_v34 = vpop.f32.mrb[0].mxu1 }
  0xd9   :  { %vm117_vm4 = vcmp.eq.f32.partialorder %v106_v34, %v323_v33  ;;  %v355_v35 = vpop.f32.mrb[1].mxu1 }
  0xda   :  { %v324_v36 = vsel %vm117_vm4, 1.0, %v466_v2 }
  0xdb   :  { %367 = vmatmul.mubr.msk.f32.vlgmr.msra.gmra.mrb[2].mxu1 %vm125_vm3, %v324_v36 }
 0x1ae   :  { %v195_v41 = vpop.f32.mrb[2].mxu1 }
 0x1af   :  { %v199_v42 = vsub.f32 %v27_v40, %v195_v41  ;;  %v368_v43 = vpop.f32.mrb[3].mxu1 }
 0x1b1   :  { %v200_v44 = vmul.f32 %v199_v42, %v199_v42 }
 0x1b3   :  { %402 = vmatmul.mubr.f32.vlgmr.msra.gmra.mrb[0].mxu0 %v200_v44 }
 0x286   :  { %v283_v45 = vpop.f32.mrb[0].mxu0 }
 0x287   :  { %440 = vrsqrt.f32 %v283_v45  ;;  %v403_v46 = vpop.f32.mrb[1].mxu0  ;;  %vm289_vm5 = vcmp.eq.f32.partialorder %v283_v45, inf  ;;  %v292_v50 = vand.u32 2147483648, %v283_v45  ;;  %vm291_vm6 = vcmp.eq.f32.partialorder %v283_v45, 0.0 }
 0x291   :  { %v441_v47 = vpop.eup %440 }
 0x292   :  { %v288_v48 = vmul.f32 %v441_v47, %v283_v45 }
 0x294   :  { %v290_v51 = vsel %vm289_vm5, %v283_v45, %v288_v48 }
 0x295   :  { %v293_v52 = vsel %vm291_vm6, %v292_v50, %v290_v51 }
 0x296   :  { %v294_v53 = vmul.f32 %v293_v52, %v30_v49 }
 0x298   :  { %v295_v54 = vsel %vm32_vm2, %v294_v53, 0.0 }
 0x299   :  { %296 = vadd.xlane.f32.xlu0 %v295_v54 }
 0x326   :  { %v297_v55 = vpop.xlane.xlu0 %296 }
 0x327   :  { %v298_v56 = vrot.slane %v297_v55, 4 }
 0x329   :  { %v299_v57 = vadd.f32 %v298_v56, %v297_v55 }
 0x32b   :  { %v300_v58 = vrot.slane %v299_v57, 2 }
 0x32d   :  { %v301_v59 = vadd.f32 %v300_v58, %v299_v57 }
 0x32f   :  { %v302_v60 = vrot.slane %v301_v59, 1 }
 0x331   :  { %v303_v61 = vadd.f32 %v302_v60, %v301_v59 }
 0x333   :  { %434 = vpush %v303_v61 }
 0x364   :  { %s435_s2 = spop %434 }
 0x365   :  { %v305_v62 = vstv %s435_s2 }
 0x366   :  { %306 = vst [vmem:[#allocation2] sm:$0xff] %v305_v62 }
 0x367   :  { %453 = shalt.err (!%p450_p4)
}
 0x368   :  { %s454_s26 = scalar_lea.hbm %s618_s7, 128 }
 0x369   :  { %p455_p5 = scmp.ne.s32.totalorder %s618_s7, %s454_s26  ;;  %p458_p6 = scmp.lt.u32.totalorder %s454_s26, %s618_s7 }
 0x36b   :  { %p460_p7 = pnand %p458_p6, %p455_p5 }
 0x36d   :  { %463 = shalt.err (!%p460_p7)
}
 0x36e   :  { %316 = dma.vmem_to_hbm [thread:$0]  %s314_s6, 128, %s618_s7, [#allocation3]  }
 0x36f   :  { %464 = dma.done.wait [#allocation3], 128  }
 0x370   :  { %465 = vsyncadd [#allocation3], 4294967168 }
 0x371   :  { %320 = vsyncpa [#allocation3], 1 }

</bundles_post_ra>
